<compile_context>
chip_gen: v7x
topology: tpu7x:2x2x1
jax: 0.10.0
libtpu: 0.0.40
codegen_flags: <defaults>
</compile_context>

<pallas_src>
import functools

import jax
import jax.numpy as jnp
from jax.experimental import pallas as pl
from jax.experimental.pallas import tpu as pltpu

# synthetic city_attr (the original script pulls these from data; pick small ones)
CITY_ATTR = {"counters": 32, "edges": 16}


def mlp_kernel(x_ref, w1_ref, b1_ref, w2_ref, b2_ref, wf_ref, bf_ref, out_ref):
    # x: (tb, C) bf16; w1, w2: (C, C) bf16 pre-transposed; wf: (C, E*3) bf16
    # biases: (1, C)/(1, E*3) f32.  All dots accumulate in f32; elementwise
    # math stays f32 (v5e VPU has no bf16).
    x = x_ref[...]

    h = jnp.dot(x, w1_ref[...], preferred_element_type=jnp.float32) + b1_ref[...]
    h = jnp.maximum(h, 0.0)                                   # ReLU(hidden1), f32

    h = jnp.dot(h.astype(jnp.bfloat16), w2_ref[...],
                preferred_element_type=jnp.float32) + b2_ref[...]
    h = jnp.maximum(h, 0.0)                                   # ReLU(hidden2), f32

    # fused predict + out: single MXU pass, (tb, E*3) store in bf16
    y = jnp.dot(h.astype(jnp.bfloat16), wf_ref[...],
                preferred_element_type=jnp.float32) + bf_ref[...]
    out_ref[...] = y.astype(out_ref.dtype)


@functools.partial(jax.jit, static_argnames=("tile_b",))
def mlp_forward(x, params, *, tile_b=4096):
    B, C = x.shape
    E = params["wp"].shape[0]           # edges (out_features of predict)
    N = E * 3                           # fused output width

    # PyTorch Linear stores weight as (out, in); pre-transpose for x @ W_t.
    # Weights/activations ship as bf16; biases stay f32 (added to f32 acc).
    w1t = params["w1"].T.astype(jnp.bfloat16)                 # (C, C)
    w2t = params["w2"].T.astype(jnp.bfloat16)                 # (C, C)
    b1 = params["b1"].reshape(1, -1).astype(jnp.float32)      # (1, C)
    b2 = params["b2"].reshape(1, -1).astype(jnp.float32)      # (1, C)

    # Fold nn.Linear(1, 3) (outer product on p.unsqueeze(-1)) into predict.
    wo = params["wo"].reshape(3)                              # column of (3,1) weight
    bo = params["bo"].reshape(3)                              # (3,)
    wpt = params["wp"].T                                      # (C, E) f32
    w_fused = (wpt[:, :, None] * wo[None, None, :]).reshape(C, N).astype(jnp.bfloat16)
    b_fused = (params["bp"][:, None] * wo[None, :] + bo[None, :]).reshape(1, N)
    b_fused = b_fused.astype(jnp.float32)

    # Batch tiling:
    #  * >=2 grid steps whenever B allows (v7x megacore + DMA/compute overlap)
    #  * tb multiple of 16 (bf16 sublane packing)
    #  * pad capped at < 16 rows beyond an even split (no full dead tiles)
    steps = max(2, pl.cdiv(B, tile_b))
    tb = max(16, pl.cdiv(pl.cdiv(B, steps), 16) * 16)
    Bp = pl.cdiv(B, tb) * tb
    grid = (Bp // tb,)

    x_bf = x.astype(jnp.bfloat16)
    if Bp != B:
        x_bf = jnp.pad(x_bf, ((0, Bp - B), (0, 0)))

    cost = pl.CostEstimate(
        flops=2 * Bp * (C * C + C * C + C * N),
        transcendentals=0,
        bytes_accessed=(2 * (Bp * C + Bp * N)              # bf16 x + out
                        + 2 * (2 * C * C + C * N)          # bf16 weights
                        + 4 * (2 * C + N)),                 # f32 biases
    )

    out_flat = pl.pallas_call(
        mlp_kernel,
        out_shape=jax.ShapeDtypeStruct((Bp, N), jnp.bfloat16),
        grid=grid,
        in_specs=[
            pl.BlockSpec((tb, C), lambda i: (i, 0)),   # x: tiled over batch
            pl.BlockSpec((C, C), lambda i: (0, 0)),    # w1t: resident
            pl.BlockSpec((1, C), lambda i: (0, 0)),    # b1
            pl.BlockSpec((C, C), lambda i: (0, 0)),    # w2t
            pl.BlockSpec((1, C), lambda i: (0, 0)),    # b2
            pl.BlockSpec((C, N), lambda i: (0, 0)),    # w_fused
            pl.BlockSpec((1, N), lambda i: (0, 0)),    # b_fused
        ],
        out_specs=pl.BlockSpec((tb, N), lambda i: (i, 0)),
        compiler_params=pltpu.CompilerParams(
            dimension_semantics=("parallel",),
        ),
        cost_estimate=cost,
    )(x_bf, w1t, b1, w2t, b2, w_fused, b_fused)

    # (Bp, E*3) bf16 -> (B, E, 3) f32; slice/reshape/cast happen outside the kernel.
    return out_flat[:B].reshape(B, E, 3).astype(jnp.float32)


def init_params(key, counters, edges):
    ks = jax.random.split(key, 8)

    def lin(kw, kb, out_f, in_f):
        bound = 1.0 / jnp.sqrt(in_f)
        w = jax.random.uniform(kw, (out_f, in_f), jnp.float32, -bound, bound)
        b = jax.random.uniform(kb, (out_f,), jnp.float32, -bound, bound)
        return w, b

    w1, b1 = lin(ks[0], ks[1], counters, counters)   # hidden1
    w2, b2 = lin(ks[2], ks[3], counters, counters)   # hidden2
    wp, bp = lin(ks[4], ks[5], edges, counters)      # predict
    wo, bo = lin(ks[6], ks[7], 3, 1)                 # out: Linear(1, 3)
    return {"w1": w1, "b1": b1, "w2": w2, "b2": b2,
            "wp": wp, "bp": bp, "wo": wo, "bo": bo}


def mlp_reference_f32(x, params):
    # pure-JAX f32 reference mirroring the PyTorch forward (un-fused order)
    h = jax.nn.relu(x @ params["w1"].T + params["b1"])
    h = jax.nn.relu(h @ params["w2"].T + params["b2"])
    p = h @ params["wp"].T + params["bp"]                       # (B, E)
    return p[..., None] @ params["wo"].T + params["bo"]         # (B, E, 3)


def mlp_reference_bf16(x, params):
    # reference that mirrors the kernel's bf16 data path (f32 accumulation)
    bf = jnp.bfloat16

    def q(a):
        return a.astype(bf).astype(jnp.float32)

    h = jax.nn.relu(q(x) @ q(params["w1"]).T + params["b1"])
    h = jax.nn.relu(q(h) @ q(params["w2"]).T + params["b2"])
    p = q(h) @ q(params["wp"]).T + params["bp"]
    return p[..., None] @ params["wo"].T + params["bo"]


if __name__ == "__main__":
    counters = CITY_ATTR["counters"]
    edges = CITY_ATTR["edges"]
    B = 2

    key = jax.random.PRNGKey(0)
    kx, kp = jax.random.split(key)
    x = jax.random.normal(kx, (B, counters), jnp.float32)
    params = init_params(kp, counters, edges)

    out = mlp_forward(x, params)
    jax.block_until_ready(out)
    assert out.shape == (B, edges, 3), out.shape

    # Tight check against a reference that emulates the kernel's bf16 data path
    # (remaining error: fused-weight reassociation + bf16 output rounding).
    ref_q = mlp_reference_bf16(x, params)
    assert jnp.allclose(out, ref_q, atol=1e-2, rtol=1e-2), \
        float(jnp.max(jnp.abs(out - ref_q)))

    # Looser sanity check against the pure-f32 PyTorch-equivalent forward.
    ref = mlp_reference_f32(x, params)
    assert jnp.allclose(out, ref, atol=5e-2, rtol=5e-2), \
        float(jnp.max(jnp.abs(out - ref)))

    print("KERNEL_OK")
</pallas_src>

<mosaic_0001>
module attributes {stable_mosaic.version = 11 : i64} {
  func.func @mlp_kernel(%arg0: i32, %arg1: memref<16x32xbf16, #tpu.memory_space<vmem>>, %arg2: memref<32x32xbf16, #tpu.memory_space<vmem>>, %arg3: memref<1x32xf32, #tpu.memory_space<vmem>>, %arg4: memref<32x32xbf16, #tpu.memory_space<vmem>>, %arg5: memref<1x32xf32, #tpu.memory_space<vmem>>, %arg6: memref<32x48xbf16, #tpu.memory_space<vmem>>, %arg7: memref<1x48xf32, #tpu.memory_space<vmem>>, %arg8: memref<16x48xbf16, #tpu.memory_space<vmem>>) attributes {dimension_semantics = [#tpu.dimension_semantics<parallel>], iteration_bounds = array<i64: 1>, scalar_prefetch = 0 : i64, scratch_operands = 0 : i64, tpu.core_type = #tpu.core_type<tc>, window_params = [{transform_indices = @transform_0, window_bounds = array<i64: 16, 32>}, {pipeline_mode = #tpu.pipeline_mode<synchronous>, transform_indices = @transform_1, window_bounds = array<i64: 32, 32>}, {pipeline_mode = #tpu.pipeline_mode<synchronous>, transform_indices = @transform_2, window_bounds = array<i64: 1, 32>}, {pipeline_mode = #tpu.pipeline_mode<synchronous>, transform_indices = @transform_3, window_bounds = array<i64: 32, 32>}, {pipeline_mode = #tpu.pipeline_mode<synchronous>, transform_indices = @transform_4, window_bounds = array<i64: 1, 32>}, {pipeline_mode = #tpu.pipeline_mode<synchronous>, transform_indices = @transform_5, window_bounds = array<i64: 32, 48>}, {pipeline_mode = #tpu.pipeline_mode<synchronous>, transform_indices = @transform_6, window_bounds = array<i64: 1, 48>}, {transform_indices = @transform_7, window_bounds = array<i64: 16, 48>}]} {
    %c0 = arith.constant 0 : index
    %c0_0 = arith.constant 0 : index
    %0 = vector.load %arg1[%c0, %c0_0] : memref<16x32xbf16, #tpu.memory_space<vmem>>, vector<16x32xbf16>
    %c0_1 = arith.constant 0 : index
    %c0_2 = arith.constant 0 : index
    %1 = vector.load %arg2[%c0_1, %c0_2] : memref<32x32xbf16, #tpu.memory_space<vmem>>, vector<32x32xbf16>
    %cst = arith.constant dense<0.000000e+00> : vector<16x32xf32>
    %2 = tpu.matmul %0, %1, %cst {dimension_numbers = #tpu.dot_dimension_numbers<[1], [0], [0], [1], [0, 0, 1, 1], [], []>} : vector<16x32xbf16>, vector<32x32xbf16>, vector<16x32xf32> -> vector<16x32xf32>
    %c0_3 = arith.constant 0 : index
    %c0_4 = arith.constant 0 : index
    %3 = vector.load %arg3[%c0_3, %c0_4] : memref<1x32xf32, #tpu.memory_space<vmem>>, vector<1x32xf32>
    %4 = vector.broadcast %3 : vector<1x32xf32> to vector<16x32xf32>
    %5 = arith.addf %2, %4 : vector<16x32xf32>
    %cst_5 = arith.constant 0.000000e+00 : f32
    %6 = vector.broadcast %cst_5 : f32 to vector<16x32xf32>
    %7 = arith.maximumf %5, %6 : vector<16x32xf32>
    %8 = arith.truncf %7 : vector<16x32xf32> to vector<16x32xbf16>
    %c0_6 = arith.constant 0 : index
    %c0_7 = arith.constant 0 : index
    %9 = vector.load %arg4[%c0_6, %c0_7] : memref<32x32xbf16, #tpu.memory_space<vmem>>, vector<32x32xbf16>
    %cst_8 = arith.constant dense<0.000000e+00> : vector<16x32xf32>
    %10 = tpu.matmul %8, %9, %cst_8 {dimension_numbers = #tpu.dot_dimension_numbers<[1], [0], [0], [1], [0, 0, 1, 1], [], []>} : vector<16x32xbf16>, vector<32x32xbf16>, vector<16x32xf32> -> vector<16x32xf32>
    %c0_9 = arith.constant 0 : index
    %c0_10 = arith.constant 0 : index
    %11 = vector.load %arg5[%c0_9, %c0_10] : memref<1x32xf32, #tpu.memory_space<vmem>>, vector<1x32xf32>
    %12 = vector.broadcast %11 : vector<1x32xf32> to vector<16x32xf32>
    %13 = arith.addf %10, %12 : vector<16x32xf32>
    %cst_11 = arith.constant 0.000000e+00 : f32
    %14 = vector.broadcast %cst_11 : f32 to vector<16x32xf32>
    %15 = arith.maximumf %13, %14 : vector<16x32xf32>
    %16 = arith.truncf %15 : vector<16x32xf32> to vector<16x32xbf16>
    %c0_12 = arith.constant 0 : index
    %c0_13 = arith.constant 0 : index
    %17 = vector.load %arg6[%c0_12, %c0_13] : memref<32x48xbf16, #tpu.memory_space<vmem>>, vector<32x48xbf16>
    %cst_14 = arith.constant dense<0.000000e+00> : vector<16x48xf32>
    %18 = tpu.matmul %16, %17, %cst_14 {dimension_numbers = #tpu.dot_dimension_numbers<[1], [0], [0], [1], [0, 0, 1, 1], [], []>} : vector<16x32xbf16>, vector<32x48xbf16>, vector<16x48xf32> -> vector<16x48xf32>
    %c0_15 = arith.constant 0 : index
    %c0_16 = arith.constant 0 : index
    %19 = vector.load %arg7[%c0_15, %c0_16] : memref<1x48xf32, #tpu.memory_space<vmem>>, vector<1x48xf32>
    %20 = vector.broadcast %19 : vector<1x48xf32> to vector<16x48xf32>
    %21 = arith.addf %18, %20 : vector<16x48xf32>
    %22 = arith.truncf %21 : vector<16x48xf32> to vector<16x48xbf16>
    %c0_17 = arith.constant 0 : index
    %c0_18 = arith.constant 0 : index
    %23 = vector.load %arg8[%c0_17, %c0_18] : memref<16x48xbf16, #tpu.memory_space<vmem>>, vector<16x48xbf16>
    tpu.vector_store %arg8[%c0_17, %c0_18], %22 {strides = array<i32>} : memref<16x48xbf16, #tpu.memory_space<vmem>>, vector<16x48xbf16>,
    return
  }
  func.func @transform_0(%arg0: i32) -> (i32, i32) {
    %c0_i32 = arith.constant 0 : i32
    %c0_i32_0 = arith.constant 0 : i32
    return %arg0, %c0_i32 : i32, i32
  }
  func.func @transform_1(%arg0: i32) -> (i32, i32) {
    %c0_i32 = arith.constant 0 : i32
    %c0_i32_0 = arith.constant 0 : i32
    %c0_i32_1 = arith.constant 0 : i32
    return %c0_i32, %c0_i32_0 : i32, i32
  }
  func.func @transform_2(%arg0: i32) -> (i32, i32) {
    %c0_i32 = arith.constant 0 : i32
    %c0_i32_0 = arith.constant 0 : i32
    %c0_i32_1 = arith.constant 0 : i32
    return %c0_i32, %c0_i32_0 : i32, i32
  }
  func.func @transform_3(%arg0: i32) -> (i32, i32) {
    %c0_i32 = arith.constant 0 : i32
    %c0_i32_0 = arith.constant 0 : i32
    %c0_i32_1 = arith.constant 0 : i32
    return %c0_i32, %c0_i32_0 : i32, i32
  }
  func.func @transform_4(%arg0: i32) -> (i32, i32) {
    %c0_i32 = arith.constant 0 : i32
    %c0_i32_0 = arith.constant 0 : i32
    %c0_i32_1 = arith.constant 0 : i32
    return %c0_i32, %c0_i32_0 : i32, i32
  }
  func.func @transform_5(%arg0: i32) -> (i32, i32) {
    %c0_i32 = arith.constant 0 : i32
    %c0_i32_0 = arith.constant 0 : i32
    %c0_i32_1 = arith.constant 0 : i32
    return %c0_i32, %c0_i32_0 : i32, i32
  }
  func.func @transform_6(%arg0: i32) -> (i32, i32) {
    %c0_i32 = arith.constant 0 : i32
    %c0_i32_0 = arith.constant 0 : i32
    %c0_i32_1 = arith.constant 0 : i32
    return %c0_i32, %c0_i32_0 : i32, i32
  }
  func.func @transform_7(%arg0: i32) -> (i32, i32) {
    %c0_i32 = arith.constant 0 : i32
    %c0_i32_0 = arith.constant 0 : i32
    return %arg0, %c0_i32 : i32, i32
  }
}

</mosaic_0001>

<bundles_post_ra>
// kernel: mlp_forward.1
= control target key start
LH: loop header
LB: loop body
LE: loop exit
PB: predicated region body
PF: predicated region fallthrough
CT: control target
= control target key end

     0   :  { %v316_v0 = vmov 0.0   ;;  %vm317_vm0 = vmmov 0   ;;  %vm57_vm1 = vcmask 261120   ;;  %vm250_vm2 = vcmask 388096   ;;  %s397_s1 = inlined_call_operand.vmem [shape: bf16[32,32], index: 1, kind: input, shape index: {}]   ;;  %s398_s0 = inlined_call_operand.vmem [shape: bf16[16,32], index: 0, kind: input, shape index: {}]   ;;  %s399_s3 = inlined_call_operand.vmem [shape: bf16[32,32], index: 3, kind: input, shape index: {}]   ;;  %s400_s2 = inlined_call_operand.vmem [shape: f32[1,32], index: 2, kind: input, shape index: {}]   ;;  %s401_s5 = inlined_call_operand.vmem [shape: bf16[32,48], index: 5, kind: input, shape index: {}]   ;;  %s402_s4 = inlined_call_operand.vmem [shape: f32[1,32], index: 4, kind: input, shape index: {}]   ;;  %s403_s6 = inlined_call_operand.vmem [shape: f32[1,48], index: 6, kind: input, shape index: {}]   ;;  %s404_s7 = inlined_call_operand.vmem [shape: bf16[16,48], index: 7, kind: output, shape index: {}]  }
   0x1   :  { %283 = vmatprep.subr.bf16.mxu0 %v316_v0  ;;  %v309_v1 = vld [vmem:[%s397_s1] sm:$0xff]   ;;  %287 = vmatprep.mubr.msk.bf16.mxu0 %vm317_vm0, %v316_v0  ;;  %v310_v2 = vld [vmem:[%s397_s1 + $0x8] sm:$0xff]  }
   0x2   :  { %291 = vmatprep.subr.bf16.mxu1 %v316_v0  ;;  %295 = vmatprep.mubr.msk.bf16.mxu1 %vm317_vm0, %v316_v0  ;;  %v311_v3 = vld [vmem:[%s398_s0] sm:$0xff]   ;;  %v313_v5 = vld [vmem:[%s399_s3 + $0x8] sm:$0xff]  }
   0x3   :  { %284 = vmatpush3.bf16.msra.mxu0 %v309_v1  ;;  %v312_v4 = vld [vmem:[%s399_s3] sm:$0xff]   ;;  %v315_v17 = vld [vmem:[%s401_s5 + $0x8] sm:$0xff]  }
   0x4   :  { %285 = vmatprep.subr.bf16.mxu0 %v316_v0  ;;  %292 = vmatpush3.bf16.msra.mxu1 %v312_v4  ;;  %v257_v6 = vld [vmem:[%s400_s2] ss:$0 sm:$0xff] }
   0x5   :  { %293 = vmatprep.subr.bf16.mxu1 %v316_v0  ;;  %v314_v16 = vld [vmem:[%s401_s5] sm:$0xff]  }
   0x6   :  { %v262_v18 = vld [vmem:[%s402_s4] ss:$0 sm:$0xff] }
   0x7   :  { %286 = vmatpush3.bf16.msra.mxu0 %v310_v2  ;;  %v266_v28 = vld [vmem:[%s403_s6] ss:$0 sm:$0xff] }
   0x8   :  { %299 = vmatprep.subr.bf16.mxu0 %v316_v0  ;;  %294 = vmatpush3.bf16.msra.mxu1 %v313_v5 }
   0xa   :  { %288 = vmatmul.mubr.msk.bf16.vlgmr.msra.gmra.mrb[0].mxu0 %vm57_vm1, %v311_v3 }
   0xb   :  { %303 = vmatprep.mubr.msk.bf16.mxu0 %vm317_vm0, %v316_v0  ;;  %300 = vmatpush3.bf16.msra.mxu0 %v314_v16 }
   0xc   :  { %301 = vmatprep.subr.bf16.mxu0 %v316_v0 }
   0xf   :  { %302 = vmatpush3.bf16.msra.mxu0 %v315_v17 }
  0xdd   :  { %v95_v7 = vpop.f32.mrb[0].mxu0 }
  0xde   :  { %v96_v8 = vadd.f32 %v257_v6, %v95_v7  ;;  %v289_v9 = vpop.f32.mrb[1].mxu0 }
  0xdf   :  { %v98_v10 = vpop.f32.mrb[2].mxu0 }
  0xe0   :  { %v99_v11 = vadd.f32 %v257_v6, %v98_v10  ;;  %v290_v12 = vpop.f32.mrb[3].mxu0  ;;  %v102_v13 = vmax.f32 %v96_v8, 0.0 }
  0xe2   :  { %v103_v14 = vmax.f32 %v99_v11, 0.0 }
  0xe4   :  { %v104_v15 = vpack.c.bf16 %v103_v14, %v102_v13 }
  0xe6   :  { %296 = vmatmul.mubr.msk.bf16.vlgmr.msra.gmra.mrb[0].mxu1 %vm57_vm1, %v104_v15 }
 0x1b9   :  { %v165_v19 = vpop.f32.mrb[0].mxu1 }
 0x1ba   :  { %v166_v20 = vadd.f32 %v262_v18, %v165_v19  ;;  %v297_v21 = vpop.f32.mrb[1].mxu1 }
 0x1bb   :  { %v168_v22 = vpop.f32.mrb[2].mxu1 }
 0x1bc   :  { %v169_v23 = vadd.f32 %v262_v18, %v168_v22  ;;  %v298_v24 = vpop.f32.mrb[3].mxu1  ;;  %v172_v25 = vmax.f32 %v166_v20, 0.0 }
 0x1be   :  { %v173_v26 = vmax.f32 %v169_v23, 0.0 }
 0x1c0   :  { %v174_v27 = vpack.c.bf16 %v173_v26, %v172_v25 }
 0x1c2   :  { %304 = vmatmul.mubr.msk.bf16.vlgmr.msra.gmra.mrb[4].mxu0 %vm57_vm1, %v174_v27 }
 0x295   :  { %v235_v29 = vpop.f32.mrb[4].mxu0 }
 0x296   :  { %v236_v30 = vadd.f32 %v266_v28, %v235_v29  ;;  %v305_v31 = vpop.f32.mrb[5].mxu0 }
 0x297   :  { %v238_v32 = vpop.f32.mrb[6].mxu0 }
 0x298   :  { %v272_v33 = vpack.c.bf16 %v236_v30, %v236_v30  ;;  %v239_v34 = vadd.f32 %v266_v28, %v238_v32  ;;  %v306_v35 = vpop.f32.mrb[7].mxu0 }
 0x29a   :  { %251 = vst.msk [vmem:[%s404_s7] sm:$0xf] %vm250_vm2, %v272_v33  ;;  %v273_v36 = vpack.c.bf16 %v239_v34, %v239_v34 }
 0x29c   :  { %252 = vst.msk [vmem:[%s404_s7 + $0x4] sm:$0xf] %vm250_vm2, %v273_v36 }

</bundles_post_ra>
